<compile_context>
chip_gen: v6e
topology: v6e:2x2x1
jax: 0.10.0
libtpu: 0.0.40
codegen_flags: <defaults>
</compile_context>

<pallas_src>
import jax
import jax.numpy as jnp
from jax import lax
from jax.experimental import pallas as pl
from jax.experimental.pallas import tpu as pltpu

GRU_DIM = 32
FC_DIM = 32
HEAD_PAD = 128          # lane-dense fused-head width (mu | logvar | zero pad)
BN_EPS = 1e-5

# Row layout of the packed [SLAB_ROWS, HEAD_PAD] parameter slab.
_OFF_W1 = 0             # rows  0:32, lanes 0:32  -> w1  [GRU_DIM, FC_DIM]
_OFF_W2 = 32            # rows 32:64, lanes 0:32  -> w2  [FC_DIM, FC_DIM]
_OFF_WHEAD = 64         # rows 64:96, lanes 0:128 -> wmu | wlv | zero-pad
_OFF_VECS = 96          # rows 96:104             -> b1,g1,be1,b2,g2,be2,b_head
SLAB_ROWS = 104


def priornet_kernel(x_ref, slab_ref, out_ref):
    x = x_ref[...]                                   # [B, GRU_DIM]
    inv_b = 1.0 / x.shape[0]                         # static batch size

    # Tile-aligned static views into the resident parameter slab.
    w1 = slab_ref[_OFF_W1:_OFF_W1 + GRU_DIM, :FC_DIM]       # [32, 32]
    w2 = slab_ref[_OFF_W2:_OFF_W2 + FC_DIM, :FC_DIM]        # [32, 32]
    w_head = slab_ref[_OFF_WHEAD:_OFF_WHEAD + FC_DIM, :]    # [32, 128]
    vecs = slab_ref[_OFF_VECS:_OFF_VECS + 8, :]              # [8, 128]

    b1 = vecs[0:1, :FC_DIM]
    g1 = vecs[1:2, :FC_DIM]
    be1 = vecs[2:3, :FC_DIM]
    b2 = vecs[3:4, :FC_DIM]
    g2 = vecs[4:5, :FC_DIM]
    be2 = vecs[5:6, :FC_DIM]
    b_head = vecs[6:7, :]                                     # [1, 128]

    def linear_bn_tanh(h_in, w, b, g, be):
        # Linear (MXU, f32 accumulate).
        h = jnp.dot(h_in, w, preferred_element_type=jnp.float32) + b
        # One-pass batch stats: two independent axis-0 reductions (XLU).
        # NOTE: E[h^2]-E[h]^2 can cancel if |mean| >> std; clamp guards rsqrt.
        s1 = jnp.sum(h, axis=0, keepdims=True)
        s2 = jnp.sum(h * h, axis=0, keepdims=True)
        mean = s1 * inv_b
        var = jnp.maximum(s2 * inv_b - mean * mean, 0.0)      # biased batch var
        # Fold BN affine into per-feature scale/shift ([1, FC_DIM] vregs),
        # leaving only mul+add on the per-element path before the EUP tanh.
        scale = g * lax.rsqrt(var + BN_EPS)
        shift = be - mean * scale
        return jnp.tanh(h * scale + shift)

    h = linear_bn_tanh(x, w1, b1, g1, be1)                    # core layer 1
    h = linear_bn_tanh(h, w2, b2, g2, be2)                    # core layer 2

    # Fused heads: single [B,32] @ [32,128] matmul, lane-dense unmasked store.
    out = jnp.dot(h, w_head, preferred_element_type=jnp.float32) + b_head
    out_ref[...] = out.astype(out_ref.dtype)


def priornet_forward_batched(x, slab):
    """x: [T, B, GRU_DIM] f32 (T independent PriorNet calls, e.g. timesteps).
    Returns (mu, logvar), each [T, B, FC_DIM]."""
    T, B, _ = x.shape

    flops = 2 * T * B * (GRU_DIM * FC_DIM + FC_DIM * FC_DIM + FC_DIM * HEAD_PAD)
    transcendentals = T * (2 * B * FC_DIM + 2 * FC_DIM)        # tanh + rsqrt
    bytes_accessed = 4 * (x.size + slab.size + T * B * HEAD_PAD)

    out = pl.pallas_call(
        priornet_kernel,
        out_shape=jax.ShapeDtypeStruct((T, B, HEAD_PAD), jnp.float32),
        grid=(T,),
        in_specs=[
            # Per-step activation tile; leading axis squeezed out of the ref.
            pl.BlockSpec((None, B, GRU_DIM), lambda t: (t, 0, 0)),
            # Parameter slab pinned to block (0, 0): fetched once, resident.
            pl.BlockSpec((SLAB_ROWS, HEAD_PAD), lambda t: (0, 0)),
        ],
        out_specs=pl.BlockSpec((None, B, HEAD_PAD), lambda t: (t, 0, 0)),
        compiler_params=pltpu.CompilerParams(
            dimension_semantics=("parallel",),     # shard T across v7x's 2 TCs
            vmem_limit_bytes=32 * 1024 * 1024,     # v5e default is only 16 MiB
        ),
        cost_estimate=pl.CostEstimate(
            flops=flops,
            transcendentals=transcendentals,
            bytes_accessed=bytes_accessed),
    )(x, slab)

    mu = out[..., :FC_DIM]
    logvar = out[..., FC_DIM:2 * FC_DIM]
    return mu, logvar


def priornet_forward(x, slab):
    """Single-call forward matching the PyTorch module: x [B, GRU_DIM]."""
    mu, logvar = priornet_forward_batched(x[None], slab)
    return mu[0], logvar[0]


def init_params(key):
    """Deterministic synthetic parameters matching PriorNet.__init__ shapes.

    Linear weights are stored already transposed to [in, out]; 1-D vectors
    (biases, BN gamma/beta) are stored as [1, FC_DIM].
    """
    ks = jax.random.split(key, 6)

    def linear(k, fan_in, fan_out):
        bound = 1.0 / jnp.sqrt(fan_in)
        kw, kb = jax.random.split(k)
        w = jax.random.uniform(kw, (fan_in, fan_out), jnp.float32, -bound, bound)
        b = jax.random.uniform(kb, (1, fan_out), jnp.float32, -bound, bound)
        return w, b

    w1, b1 = linear(ks[0], GRU_DIM, FC_DIM)
    w2, b2 = linear(ks[1], FC_DIM, FC_DIM)
    wmu, bmu = linear(ks[2], FC_DIM, FC_DIM)
    wlv, blv = linear(ks[3], FC_DIM, FC_DIM)
    # BatchNorm1d affine params (PyTorch init: gamma=1, beta=0); perturb gamma
    # slightly so the affine path is exercised.
    g1 = jnp.ones((1, FC_DIM), jnp.float32) + 0.01 * jax.random.normal(ks[4], (1, FC_DIM))
    be1 = jnp.zeros((1, FC_DIM), jnp.float32)
    g2 = jnp.ones((1, FC_DIM), jnp.float32) + 0.01 * jax.random.normal(ks[5], (1, FC_DIM))
    be2 = jnp.zeros((1, FC_DIM), jnp.float32)
    return dict(w1=w1, b1=b1, g1=g1, be1=be1,
                w2=w2, b2=b2, g2=g2, be2=be2,
                wmu=wmu, bmu=bmu, wlv=wlv, blv=blv)


def pack_params(p):
    """Pack all 13 parameter tensors into one [SLAB_ROWS, HEAD_PAD] f32 slab."""
    slab = jnp.zeros((SLAB_ROWS, HEAD_PAD), jnp.float32)
    slab = slab.at[_OFF_W1:_OFF_W1 + GRU_DIM, :FC_DIM].set(p["w1"])
    slab = slab.at[_OFF_W2:_OFF_W2 + FC_DIM, :FC_DIM].set(p["w2"])
    slab = slab.at[_OFF_WHEAD:_OFF_WHEAD + FC_DIM, :FC_DIM].set(p["wmu"])
    slab = slab.at[_OFF_WHEAD:_OFF_WHEAD + FC_DIM, FC_DIM:2 * FC_DIM].set(p["wlv"])
    v = _OFF_VECS
    slab = slab.at[v + 0, :FC_DIM].set(p["b1"][0])
    slab = slab.at[v + 1, :FC_DIM].set(p["g1"][0])
    slab = slab.at[v + 2, :FC_DIM].set(p["be1"][0])
    slab = slab.at[v + 3, :FC_DIM].set(p["b2"][0])
    slab = slab.at[v + 4, :FC_DIM].set(p["g2"][0])
    slab = slab.at[v + 5, :FC_DIM].set(p["be2"][0])
    slab = slab.at[v + 6, :FC_DIM].set(p["bmu"][0])
    slab = slab.at[v + 6, FC_DIM:2 * FC_DIM].set(p["blv"][0])
    return slab


def priornet_reference(x, p):
    """Pure-JAX reference of the same forward (x: [B, GRU_DIM])."""
    def bn(h, g, be):
        mean = jnp.mean(h, axis=0, keepdims=True)
        var = jnp.mean((h - mean) ** 2, axis=0, keepdims=True)   # biased, torch BN fwd
        return (h - mean) / jnp.sqrt(var + BN_EPS) * g + be

    h = jnp.tanh(bn(x @ p["w1"] + p["b1"], p["g1"], p["be1"]))
    h = jnp.tanh(bn(h @ p["w2"] + p["b2"], p["g2"], p["be2"]))
    return h @ p["wmu"] + p["bmu"], h @ p["wlv"] + p["blv"]


if __name__ == "__main__":
    key = jax.random.PRNGKey(0)
    kx, kp = jax.random.split(key)
    T, B = 4, 8                           # T independent PriorNet calls, batch 8
    x = jax.random.normal(kx, (T, B, GRU_DIM), jnp.float32)
    raw = init_params(kp)
    slab = pack_params(raw)

    # Gridded path (T calls pipelined in one pallas_call).
    mu, logvar = priornet_forward_batched(x, slab)
    jax.block_until_ready((mu, logvar))

    # Single-call path matching the PyTorch module signature.
    mu1, lv1 = priornet_forward(x[0], slab)
    jax.block_until_ready((mu1, lv1))

    # Correctness vs. pure-JAX reference (per-call batch statistics).
    mu_ref, lv_ref = jax.vmap(lambda xt: priornet_reference(xt, raw))(x)
    assert mu.shape == (T, B, FC_DIM) and logvar.shape == (T, B, FC_DIM)
    assert jnp.allclose(mu, mu_ref, atol=1e-4, rtol=1e-4)
    assert jnp.allclose(logvar, lv_ref, atol=1e-4, rtol=1e-4)
    assert jnp.allclose(mu1, mu_ref[0], atol=1e-4, rtol=1e-4)
    assert jnp.allclose(lv1, lv_ref[0], atol=1e-4, rtol=1e-4)

    print("KERNEL_OK")
</pallas_src>

<mosaic_0001>
module attributes {stable_mosaic.version = 11 : i64} {
  func.func @priornet_kernel(%arg0: i32, %arg1: memref<1x8x32xf32, #tpu.memory_space<vmem>>, %arg2: memref<104x128xf32, #tpu.memory_space<vmem>>, %arg3: memref<1x8x128xf32, #tpu.memory_space<vmem>>) attributes {dimension_semantics = [#tpu.dimension_semantics<parallel>], iteration_bounds = array<i64: 4>, scalar_prefetch = 0 : i64, scratch_operands = 0 : i64, tpu.core_type = #tpu.core_type<tc>, window_params = [{transform_indices = @transform_0, window_bounds = array<i64: 1, 8, 32>}, {pipeline_mode = #tpu.pipeline_mode<synchronous>, transform_indices = @transform_1, window_bounds = array<i64: 104, 128>}, {transform_indices = @transform_2, window_bounds = array<i64: 1, 8, 128>}]} {
    %c0 = arith.constant 0 : index
    %c0_0 = arith.constant 0 : index
    %c0_1 = arith.constant 0 : index
    %0 = vector.load %arg1[%c0, %c0_0, %c0_1] : memref<1x8x32xf32, #tpu.memory_space<vmem>>, vector<1x8x32xf32>
    %1 = vector.shape_cast %0 : vector<1x8x32xf32> to vector<8x32xf32>
    %c0_2 = arith.constant 0 : index
    %c0_3 = arith.constant 0 : index
    %2 = vector.load %arg2[%c0_2, %c0_3] : memref<104x128xf32, #tpu.memory_space<vmem>>, vector<32x32xf32>
    %c32 = arith.constant 32 : index
    %c0_4 = arith.constant 0 : index
    %3 = vector.load %arg2[%c32, %c0_4] : memref<104x128xf32, #tpu.memory_space<vmem>>, vector<32x32xf32>
    %c64 = arith.constant 64 : index
    %c0_5 = arith.constant 0 : index
    %4 = vector.load %arg2[%c64, %c0_5] : memref<104x128xf32, #tpu.memory_space<vmem>>, vector<32x128xf32>
    %c96 = arith.constant 96 : index
    %c0_6 = arith.constant 0 : index
    %5 = vector.load %arg2[%c96, %c0_6] : memref<104x128xf32, #tpu.memory_space<vmem>>, vector<8x128xf32>
    %6 = vector.extract_strided_slice %5 {offsets = [0, 0], sizes = [1, 32], strides = [1, 1]} : vector<8x128xf32> to vector<1x32xf32>
    %7 = vector.extract_strided_slice %5 {offsets = [1, 0], sizes = [1, 32], strides = [1, 1]} : vector<8x128xf32> to vector<1x32xf32>
    %8 = vector.extract_strided_slice %5 {offsets = [2, 0], sizes = [1, 32], strides = [1, 1]} : vector<8x128xf32> to vector<1x32xf32>
    %9 = vector.extract_strided_slice %5 {offsets = [3, 0], sizes = [1, 32], strides = [1, 1]} : vector<8x128xf32> to vector<1x32xf32>
    %10 = vector.extract_strided_slice %5 {offsets = [4, 0], sizes = [1, 32], strides = [1, 1]} : vector<8x128xf32> to vector<1x32xf32>
    %11 = vector.extract_strided_slice %5 {offsets = [5, 0], sizes = [1, 32], strides = [1, 1]} : vector<8x128xf32> to vector<1x32xf32>
    %12 = vector.extract_strided_slice %5 {offsets = [6, 0], sizes = [1, 128], strides = [1, 1]} : vector<8x128xf32> to vector<1x128xf32>
    %cst = arith.constant dense<0.000000e+00> : vector<8x32xf32>
    %13 = tpu.matmul %1, %2, %cst {dimension_numbers = #tpu.dot_dimension_numbers<[1], [0], [0], [1], [0, 0, 1, 1], [], []>} : vector<8x32xf32>, vector<32x32xf32>, vector<8x32xf32> -> vector<8x32xf32>
    %14 = vector.broadcast %6 : vector<1x32xf32> to vector<8x32xf32>
    %15 = arith.addf %13, %14 : vector<8x32xf32>
    %cst_7 = arith.constant dense<0.000000e+00> : vector<32xf32>
    %16 = vector.multi_reduction <add>, %15, %cst_7 [0] : vector<8x32xf32> to vector<32xf32>
    %17 = vector.shape_cast %16 : vector<32xf32> to vector<1x32xf32>
    %18 = arith.mulf %15, %15 : vector<8x32xf32>
    %cst_8 = arith.constant dense<0.000000e+00> : vector<32xf32>
    %19 = vector.multi_reduction <add>, %18, %cst_8 [0] : vector<8x32xf32> to vector<32xf32>
    %20 = vector.shape_cast %19 : vector<32xf32> to vector<1x32xf32>
    %cst_9 = arith.constant 1.250000e-01 : f32
    %21 = vector.broadcast %cst_9 : f32 to vector<1x32xf32>
    %22 = arith.mulf %17, %21 : vector<1x32xf32>
    %cst_10 = arith.constant 1.250000e-01 : f32
    %23 = vector.broadcast %cst_10 : f32 to vector<1x32xf32>
    %24 = arith.mulf %20, %23 : vector<1x32xf32>
    %25 = arith.mulf %22, %22 : vector<1x32xf32>
    %26 = arith.subf %24, %25 : vector<1x32xf32>
    %cst_11 = arith.constant 0.000000e+00 : f32
    %27 = vector.broadcast %cst_11 : f32 to vector<1x32xf32>
    %28 = arith.maximumf %26, %27 : vector<1x32xf32>
    %cst_12 = arith.constant 9.99999974E-6 : f32
    %29 = vector.broadcast %cst_12 : f32 to vector<1x32xf32>
    %30 = arith.addf %28, %29 : vector<1x32xf32>
    %31 = math.rsqrt %30 : vector<1x32xf32>
    %32 = arith.mulf %7, %31 : vector<1x32xf32>
    %33 = arith.mulf %22, %32 : vector<1x32xf32>
    %34 = arith.subf %8, %33 : vector<1x32xf32>
    %35 = vector.broadcast %32 : vector<1x32xf32> to vector<8x32xf32>
    %36 = arith.mulf %15, %35 : vector<8x32xf32>
    %37 = vector.broadcast %34 : vector<1x32xf32> to vector<8x32xf32>
    %38 = arith.addf %36, %37 : vector<8x32xf32>
    %39 = math.tanh %38 : vector<8x32xf32>
    %cst_13 = arith.constant dense<0.000000e+00> : vector<8x32xf32>
    %40 = tpu.matmul %39, %3, %cst_13 {dimension_numbers = #tpu.dot_dimension_numbers<[1], [0], [0], [1], [0, 0, 1, 1], [], []>} : vector<8x32xf32>, vector<32x32xf32>, vector<8x32xf32> -> vector<8x32xf32>
    %41 = vector.broadcast %9 : vector<1x32xf32> to vector<8x32xf32>
    %42 = arith.addf %40, %41 : vector<8x32xf32>
    %cst_14 = arith.constant dense<0.000000e+00> : vector<32xf32>
    %43 = vector.multi_reduction <add>, %42, %cst_14 [0] : vector<8x32xf32> to vector<32xf32>
    %44 = vector.shape_cast %43 : vector<32xf32> to vector<1x32xf32>
    %45 = arith.mulf %42, %42 : vector<8x32xf32>
    %cst_15 = arith.constant dense<0.000000e+00> : vector<32xf32>
    %46 = vector.multi_reduction <add>, %45, %cst_15 [0] : vector<8x32xf32> to vector<32xf32>
    %47 = vector.shape_cast %46 : vector<32xf32> to vector<1x32xf32>
    %cst_16 = arith.constant 1.250000e-01 : f32
    %48 = vector.broadcast %cst_16 : f32 to vector<1x32xf32>
    %49 = arith.mulf %44, %48 : vector<1x32xf32>
    %cst_17 = arith.constant 1.250000e-01 : f32
    %50 = vector.broadcast %cst_17 : f32 to vector<1x32xf32>
    %51 = arith.mulf %47, %50 : vector<1x32xf32>
    %52 = arith.mulf %49, %49 : vector<1x32xf32>
    %53 = arith.subf %51, %52 : vector<1x32xf32>
    %cst_18 = arith.constant 0.000000e+00 : f32
    %54 = vector.broadcast %cst_18 : f32 to vector<1x32xf32>
    %55 = arith.maximumf %53, %54 : vector<1x32xf32>
    %cst_19 = arith.constant 9.99999974E-6 : f32
    %56 = vector.broadcast %cst_19 : f32 to vector<1x32xf32>
    %57 = arith.addf %55, %56 : vector<1x32xf32>
    %58 = math.rsqrt %57 : vector<1x32xf32>
    %59 = arith.mulf %10, %58 : vector<1x32xf32>
    %60 = arith.mulf %49, %59 : vector<1x32xf32>
    %61 = arith.subf %11, %60 : vector<1x32xf32>
    %62 = vector.broadcast %59 : vector<1x32xf32> to vector<8x32xf32>
    %63 = arith.mulf %42, %62 : vector<8x32xf32>
    %64 = vector.broadcast %61 : vector<1x32xf32> to vector<8x32xf32>
    %65 = arith.addf %63, %64 : vector<8x32xf32>
    %66 = math.tanh %65 : vector<8x32xf32>
    %cst_20 = arith.constant dense<0.000000e+00> : vector<8x128xf32>
    %67 = tpu.matmul %66, %4, %cst_20 {dimension_numbers = #tpu.dot_dimension_numbers<[1], [0], [0], [1], [0, 0, 1, 1], [], []>} : vector<8x32xf32>, vector<32x128xf32>, vector<8x128xf32> -> vector<8x128xf32>
    %68 = vector.broadcast %12 : vector<1x128xf32> to vector<8x128xf32>
    %69 = arith.addf %67, %68 : vector<8x128xf32>
    %c0_21 = arith.constant 0 : index
    %c0_22 = arith.constant 0 : index
    %c0_23 = arith.constant 0 : index
    %70 = vector.load %arg3[%c0_21, %c0_22, %c0_23] : memref<1x8x128xf32, #tpu.memory_space<vmem>>, vector<1x8x128xf32>
    %71 = vector.shape_cast %70 : vector<1x8x128xf32> to vector<8x128xf32>
    %72 = vector.shape_cast %69 : vector<8x128xf32> to vector<1x8x128xf32>
    tpu.vector_store %arg3[%c0_21, %c0_22, %c0_23], %72 {strides = array<i32>} : memref<1x8x128xf32, #tpu.memory_space<vmem>>, vector<1x8x128xf32>,
    return
  }
  func.func @transform_0(%arg0: i32) -> (i32, i32, i32) {
    %c0_i32 = arith.constant 0 : i32
    %c0_i32_0 = arith.constant 0 : i32
    %c0_i32_1 = arith.constant 0 : i32
    return %arg0, %c0_i32, %c0_i32_0 : i32, i32, i32
  }
  func.func @transform_1(%arg0: i32) -> (i32, i32) {
    %c0_i32 = arith.constant 0 : i32
    %c0_i32_0 = arith.constant 0 : i32
    %c0_i32_1 = arith.constant 0 : i32
    return %c0_i32, %c0_i32_0 : i32, i32
  }
  func.func @transform_2(%arg0: i32) -> (i32, i32, i32) {
    %c0_i32 = arith.constant 0 : i32
    %c0_i32_0 = arith.constant 0 : i32
    %c0_i32_1 = arith.constant 0 : i32
    return %arg0, %c0_i32, %c0_i32_0 : i32, i32, i32
  }
}

</mosaic_0001>

<bundles_post_ra>
// kernel: tpu_custom_call.1
= control target key start
LH: loop header
LB: loop body
LE: loop exit
PB: predicated region body
PF: predicated region fallthrough
CT: control target
= control target key end

     0   :  { %7 = vsyncpa [#allocation3], 0  ;;  %s1078_s0 = inlined_call_operand.hbm [shape: f32[4,8,32], index: 0, kind: input, shape index: {}]   ;;  %s1079_s1 = inlined_call_operand.hbm [shape: f32[104,128], index: 1, kind: input, shape index: {}]   ;;  %s1080_s2 = inlined_call_operand.hbm [shape: f32[4,8,128], index: 2, kind: output, shape index: {}]  }
   0x1   :  { %9 = vsyncpa [#allocation3 + $0x1], 0 }
   0x2   :  { %10 = vsyncpa [#allocation6], 0 }
   0x3   :  { %11 = vsyncpa [#allocation4], 0 }
   0x4   :  { %13 = vsyncpa [#allocation4 + $0x1], 0  ;;  %s873_s9 = smov 0   ;;  %s875_s10 = smov 0  }
   0x5   :  { %s877_s11 = smov 0   ;;  %s879_s12 = smov 0  }
   0x6 LB: > { %s894_s13 = sadd.s32 4294967295, %s849_s12   ;;  %s593_s14 = sadd.s32 4294967294, %s849_s12   ;;  %s849_s12 = sphi %s879_s12, %s1101_s12   ;;  %s845_s11 = sphi %s877_s11, %s1100_s11   ;;  %s841_s10 = sphi %s875_s10, %s1099_s10   ;;  %s837_s9 = sphi %s873_s9, %s1098_s9  }
   0x7   : > { %p39_p0 = scmp.ne.s32.totalorder %s841_s10, %s837_s9  ;;  %p1081_p1 = scmp.eq.s32.totalorder %s894_s13, 0 }
   0x8   : > { %p90_p3 = scmp.eq.s32.totalorder %s593_s14, 3  ;;  %p594_p5 = scmp.ge.s32.totalorder %s849_s12, 1 }
   0x9   : > { %p903_p4 = por %p1081_p1, %p39_p0  ;;  %p97_p7 = scmp.lt.s32.totalorder %s849_s12, 5 }
   0xa   : > { %p908_p6 = por %p90_p3, %p39_p0  ;;  %s851_s18 = smov [#allocation5]  }
   0xb   : > { %s1085_s15 = scalar_select %p903_p4, 1, 0 }
   0xc   : > { %s1086_s16 = scalar_select %p908_p6, 1, 0 }
   0xd   : > { %p913_p8 = pnand %p594_p5, %p97_p7  ;;  %s109_s19 = sshll.u32 %s851_s18, 4  ;;  %s110_s19 = int_to_ptr.vmem [resolvable:$true] %s109_s19 }
   0xe   : > { %s926_s21 = sadd.s32 1, %s849_s12   ;;  %s26_s22 = sadd.s32 1, %s845_s11 }
   0xf   : > { %s1087_s17 = scalar_select %p913_p8, 1, 0 }
  0x10   : > { %p666_p9 = pneg %p913_p8  ;;  %s23_s23 = ssub.s32 %s849_s12, %s926_s21 }
  0x11   : > { %s738_s24 = scalar_lea.vmem %s110_s19, 1664  ;;  %p746_p3 = scmp.lt.s32.totalorder %s110_s19, %s110_s19 }
  0x12   : > { %p921_p10 = pnand %p666_p9, %p1081_p1  ;;  %p739_p12 = scmp.ne.s32.totalorder %s110_s19, %s738_s24 }
  0x13   : > { %p747_p5 = scmp.lt.s32.totalorder %s738_s24, %s738_s24 }
  0x14   : > { %p729_p11 = pneg %p921_p10 }
  0x15   : > { %p748_p7 = por %p747_p5, %p746_p3 }
  0x16   : > { %p741_p13 = pnand %p739_p12, %p729_p11 }
  0x18   : > { %p742_p0 = pneg %p741_p13 }
  0x1a   : > { %p749_p2 = pnand %p748_p7, %p742_p0 }
  0x1c   : > { %752 = shalt.err (!%p749_p2)
}
  0x1d   : > { %s852_s25 = smov 128   ;;  %s853_s26 = smov 8  }
  0x1e   : > { %669 = dma.hbm_to_vmem [thread:$0]  (!%p921_p10), %s1079_s1, 1664, %s110_s19, [#allocation6], %s852_s25, %s852_s25, %s853_s26  }
  0x1f   : > { %p24_p9 = scmp.eq.s32.totalorder %s23_s23, 0  ;;  %p33_p11 = scmp.ne.s32.totalorder %s845_s11, %s841_s10 }
  0x20   : > { %p34_p12 = scmp.eq.s32.totalorder %s849_s12, 0  ;;  %p679_p2 = scmp.lt.s32.totalorder %s849_s12, 4 }
  0x21   : > { %s943_s29 = scalar_select %p24_p9, %s845_s11, %s26_s22  }
  0x22   : > { %p35_p13 = por %p34_p12, %p33_p11  ;;  %p1089_p0 = scmp.eq.s32.totalorder %s894_s13, 3 }
  0x23   : > { %s123_s3 = sand.u32 1, %s845_s11   ;;  %s598_s4 = sshll.u32 %s849_s12, 7 }
  0x24   : > { %p947_p3 = por %p1089_p0, %p33_p11  ;;  %s597_s5 = sshll.u32 %s123_s3, 3 }
  0x25   : > { %s956_s8 = scalar_lea.hbm %s1078_s0, %s598_s4  ;;  %s127_s14 = scalar_lea.vmem [#allocation2], %s597_s5 }
  0x26   : > { %s1090_s30 = scalar_select %p947_p3, 1, 0 }
  0x27   : > { %s134_s18 = sshll.u32 %s127_s14, 4  ;;  %p958_p10 = pnand %p679_p2, %p35_p13  ;;  %s135_s18 = int_to_ptr.vmem [resolvable:$true] %s134_s18 }
  0x28   : > { %s124_s20 = scalar_lea.sflag [#allocation3], %s123_s3  ;;  %s753_s22 = scalar_lea.hbm %s956_s8, 128 }
  0x29   : > { %p754_p5 = scmp.ne.s32.totalorder %s956_s8, %s753_s22  ;;  %p755_p7 = pneg %p958_p10 }
  0x2a   : > { %s758_s25 = scalar_lea.hbm %s1078_s0, 512  ;;  %p759_p12 = scmp.lt.s32.totalorder %s956_s8, %s1078_s0 }
  0x2b   : > { %p756_p9 = pnand %p755_p7, %p754_p5  ;;  %p760_p2 = scmp.lt.s32.totalorder %s758_s25, %s753_s22 }
  0x2d   : > { %p757_p11 = pneg %p756_p9  ;;  %p761_p13 = por %p760_p2, %p759_p12 }
  0x2f   : > { %p762_p0 = pnand %p761_p13, %p757_p11 }
  0x31   : > { %765 = shalt.err (!%p762_p0)
}
  0x32   : > { %s766_s28 = scalar_lea.vmem %s135_s18, 128  ;;  %s854_s3 = smov [#allocation2]  }
  0x33   : > { %p767_p1 = scmp.ne.s32.totalorder %s135_s18, %s766_s28  ;;  %s771_s4 = sshll.u32 %s854_s3, 4  ;;  %s772_s4 = int_to_ptr.vmem [resolvable:$false] %s771_s4 }
  0x34   : > { %s773_s5 = scalar_lea.vmem %s772_s4, 256  ;;  %p774_p5 = scmp.lt.s32.totalorder %s135_s18, %s772_s4 }
  0x35   : > { %p769_p6 = pnand %p767_p1, %p755_p7  ;;  %p775_p9 = scmp.lt.s32.totalorder %s773_s5, %s766_s28 }
  0x37   : > { %p770_p3 = pneg %p769_p6  ;;  %p776_p4 = por %p775_p9, %p774_p5 }
  0x39   : > { %p777_p8 = pnand %p776_p4, %p770_p3 }
  0x3b   : > { %780 = shalt.err (!%p777_p8)
}
  0x3c   : > { %673 = dma.hbm_to_vmem [thread:$0]  (!%p958_p10), %s956_s8, 128, %s135_s18, %s124_s20  }
  0x3d   : > { %p1092_p11 = scmp.ne.s32.totalorder %s1087_s17, 0 }
  0x3e   : > { %s979_s6 = sand.u32 (!%p1092_p11), 1, %s841_s10   ;;  %p1093_p1 = scmp.ne.s32.totalorder (!%p1092_p11), %s1085_s15, 0 }
  0x3f   : > { %143 = sbr.rel (%p1092_p11) target bundleno = 806 (0x326), region = 28  ;;  %s600_s7 = sshll.u32 (!%p1092_p11), %s979_s6, 3 }
  0x40   : > { %s146_s14 = scalar_lea.sflag (!%p1092_p11), [#allocation3], %s979_s6  ;;  %s149_s22 = scalar_lea.vmem (!%p1092_p11), [#allocation2], %s600_s7 }
  0x44   : > { %824 = dma.done.wait (%p1093_p1), %s146_s14, 128  }
  0x45   : > { %826 = vsyncadd (%p1093_p1), %s146_s14, 4294967168  ;;  %p1094_p4 = scmp.eq.s32.totalorder %s894_s13, 0 }
  0x47   : > { %828 = dma.done.wait (%p1094_p4), [#allocation6], 1664   ;;  %p1095_p6 = pmov %p1094_p4 }
  0x48   : > { %v855_v0 = vmov 0.0   ;;  %vm856_vm0 = vmmov 0   ;;  %v178_v1 = vld [vmem:[#allocation5 + $0x18] sm:$0xff]  ;;  %v177_v2 = vld [vmem:[#allocation5 + $0x10] sm:$0xff]  ;;  %v176_v3 = vld [vmem:[#allocation5 + $0x8] sm:$0xff]  ;;  %vm192_vm1 = vcmask 261120   ;;  %v188_v10 = vlaneseq }
  0x49   : > { %830 = vsyncadd (%p1095_p6), [#allocation6], 4294965632  ;;  %625 = vmatprep.subr.mxu0 %v855_v0  ;;  %633 = vmatprep.mubr.msk.f32.mxu0 %vm856_vm0, %v855_v0  ;;  %v175_v4 = vld [vmem:[#allocation5] sm:$0xff]  ;;  %v174_v5 = vld [vmem:[%s149_s22] sm:$0xff]  ;;  %s607_s15 = sshll.u32 %s894_s13, 7  ;;  %s173_s17 = scalar_lea.vmem [#allocation7], %s600_s7 }
  0x4a   : > { %636 = vmatprep.subr.mxu1 %v855_v0  ;;  %644 = vmatprep.mubr.msk.f32.mxu1 %vm856_vm0, %v855_v0  ;;  %v182_v6 = vld [vmem:[#allocation5 + $0x38] sm:$0xff]  ;;  %v181_v7 = vld [vmem:[#allocation5 + $0x30] sm:$0xff]  ;;  %v180_v8 = vld [vmem:[#allocation5 + $0x28] sm:$0xff]  ;;  %v1009_v11 = vshrl.u32 %v188_v10, 7  ;;  %s513_s8 = sshll.u32 %s173_s17, 4  ;;  %s1042_s20 = scalar_lea.hbm %s1080_s2, %s607_s15  ;;  %s514_s8 = int_to_ptr.vmem [resolvable:$true] %s513_s8 }
  0x4b   : > { %626 = vmatpush3.msra.mxu0 %v178_v1  ;;  %637 = vmatpush3.msra.mxu1 %v182_v6  ;;  %v179_v9 = vld [vmem:[#allocation5 + $0x20] sm:$0xff]  ;;  %v186_v51 = vld [vmem:[#allocation5 + $0x58] sm:$0xff]  ;;  %v185_v52 = vld [vmem:[#allocation5 + $0x50] sm:$0xff]  ;;  %s500_s23 = scalar_lea.sflag [#allocation4], %s979_s6  ;;  %s781_s24 = scalar_lea.vmem %s514_s8, 128 }
  0x4c   : > { %627 = vmatprep.subr.mxu0 %v855_v0  ;;  %638 = vmatprep.subr.mxu1 %v855_v0  ;;  %v190_v12 = vsub.s32 0, %v1009_v11  ;;  %v1012_v13 = vld [vmem:[#allocation5 + $0x60] sm:$0xff]  ;;  %v296_v41 = vsub.s32 1, %v1009_v11  ;;  %v301_v45 = vsub.s32 2, %v1009_v11  ;;  %v184_v53 = vld [vmem:[#allocation5 + $0x48] sm:$0xff]  ;;  %v307_v55 = vsub.s32 3, %v1009_v11  ;;  %p782_p8 = scmp.ne.s32.totalorder %s514_s8, %s781_s24 }
  0x4d   : > { %628 = vmatpush3.msra.mxu0 %v177_v2  ;;  %639 = vmatpush3.msra.mxu1 %v181_v7  ;;  %v183_v54 = vld [vmem:[#allocation5 + $0x40] sm:$0xff]  ;;  %p1096_p3 = scmp.ne.s32.totalorder %s1090_s30, 0  ;;  %s857_s13 = smov [#allocation7]  }
  0x4e   : > { %629 = vmatprep.subr.mxu0 %v855_v0  ;;  %640 = vmatprep.subr.mxu1 %v855_v0  ;;  %v191_v14 = vrot.slane %v1012_v13, %v190_v12  ;;  %v308_v56 = vrot.slane %v1012_v13, %v307_v55  ;;  %s785_s25 = sshll.u32 %s857_s13, 4  ;;  %s786_s25 = int_to_ptr.vmem [resolvable:$false] %s785_s25 }
  0x4f   : > { %630 = vmatpush3.msra.mxu0 %v176_v3  ;;  %641 = vmatpush3.msra.mxu1 %v180_v8  ;;  %p783_p10 = pnand %p782_p8, %p1096_p3  ;;  %s787_s26 = scalar_lea.vmem %s786_s25, 256 }
  0x50   : > { %631 = vmatprep.subr.mxu0 %v855_v0  ;;  %642 = vmatprep.subr.mxu1 %v855_v0  ;;  %p788_p12 = scmp.lt.s32.totalorder %s514_s8, %s786_s25  ;;  %p789_p2 = scmp.lt.s32.totalorder %s787_s26, %s781_s24 }
  0x51   : > { %632 = vmatpush3.msra.mxu0 %v175_v4  ;;  %643 = vmatpush3.msra.mxu1 %v179_v9  ;;  %p784_p7 = pneg %p783_p10 }
  0x52   : > { %634 = vmatmul.mubr.msk.f32.vlgmr.msra.gmra.mxu0 %vm192_vm1, %v174_v5  ;;  %647 = vmatprep.subr.mxu0 %v855_v0  ;;  %p790_p13 = por %p789_p2, %p788_p12 }
  0x53   : > { %655 = vmatprep.mubr.msk.f32.mxu0 %vm856_vm0, %v855_v0  ;;  %648 = vmatpush3.msra.mxu0 %v186_v51 }
  0x54   : > { %649 = vmatprep.subr.mxu0 %v855_v0  ;;  %p791_p0 = pnand %p790_p13, %p784_p7 }
  0x55   : > { %650 = vmatpush3.msra.mxu0 %v185_v52 }
  0x56   : > { %651 = vmatprep.subr.mxu0 %v855_v0 }
  0x57   : > { %652 = vmatpush3.msra.mxu0 %v184_v53 }
  0x58   : > { %653 = vmatprep.subr.mxu0 %v855_v0 }
  0x59   : > { %654 = vmatpush3.msra.mxu0 %v183_v54 }
 0x112   : > { %v262_v15 = vpop.f32.mrf.mxu0 }
 0x113   : > { %v263_v16 = vadd.f32 %v262_v15, %v191_v14 }
 0x114   : > { %v635_v17 = vpop.f32.mrf.mxu0 }
 0x115   : > { %v266_v18 = vsel %vm192_vm1, %v263_v16, 0.0  ;;  %v273_v19 = vmul.f32 %v263_v16, %v263_v16 }
 0x116   : > { %v267_v20 = vrot.slane %v266_v18, 4 }
 0x117   : > { %v274_v21 = vsel %vm192_vm1, %v273_v19, 0.0 }
 0x118   : > { %v268_v22 = vadd.f32 %v267_v20, %v266_v18  ;;  %v275_v23 = vrot.slane %v274_v21, 4 }
 0x11a   : > { %v269_v24 = vrot.slane %v268_v22, 2  ;;  %v276_v25 = vadd.f32 %v275_v23, %v274_v21  ;;  %v412_v21 = vsub.s32 4, %v1009_v11 }
 0x11c   : > { %v270_v26 = vadd.f32 %v269_v24, %v268_v22  ;;  %v277_v27 = vrot.slane %v276_v25, 2 }
 0x11e   : > { %v271_v28 = vrot.slane %v270_v26, 1  ;;  %v278_v29 = vadd.f32 %v277_v27, %v276_v25  ;;  %v417_v25 = vsub.s32 5, %v1009_v11 }
 0x120   : > { %v272_v30 = vadd.f32 %v271_v28, %v270_v26  ;;  %v279_v31 = vrot.slane %v278_v29, 1 }
 0x122   : > { %v280_v32 = vadd.f32 %v279_v31, %v278_v29  ;;  %v281_v33 = vmul.f32 0.125, %v272_v30  ;;  %v423_v31 = vsub.s32 6, %v1009_v11 }
 0x124   : > { %v282_v34 = vmul.f32 0.125, %v280_v32  ;;  %v283_v35 = vmul.f32 %v281_v33, %v281_v33  ;;  %v424_v32 = vrot.slane %v1012_v13, %v423_v31 }
 0x126   : > { %v284_v36 = vsub.f32 %v282_v34, %v283_v35 }
 0x128   : > { %v285_v37 = vmax.f32 %v284_v36, 0.0 }
 0x12a   : > { %v286_v38 = vadd.f32 1e-05, %v285_v37 }
 0x12c   : > { %719 = vrsqrt.f32 %v286_v38 }
 0x139   : > { %v720_v39 = vpop.eup %719 }
 0x13a   : > { %v288_v40 = vmul.f32 %v720_v39, %v1012_v13 }
 0x13c   : > { %v289_v42 = vmul.f32 %v288_v40, %v281_v33  ;;  %v297_v44 = vrot.slane %v288_v40, %v296_v41 }
 0x13e   : > { %v291_v43 = vrot.slane %v289_v42, 7  ;;  %v298_v47 = vmul.f32 %v297_v44, %v263_v16 }
 0x140   : > { %v293_v46 = vsub.f32 %v1012_v13, %v291_v43 }
 0x142   : > { %v302_v48 = vrot.slane %v293_v46, %v301_v45 }
 0x144   : > { %v303_v49 = vadd.f32 %v302_v48, %v298_v47 }
 0x146   : > { %721 = vtanh.f32 %v303_v49 }
 0x153   : > { %v722_v50 = vpop.eup %721 }
 0x154   : > { %645 = vmatmul.mubr.msk.f32.vlgmr.msra.gmra.mxu1 %vm192_vm1, %v722_v50 }
 0x214   : > { %v378_v57 = vpop.f32.mrf.mxu1 }
 0x215   : > { %v379_v58 = vadd.f32 %v378_v57, %v308_v56 }
 0x216   : > { %v646_v59 = vpop.f32.mrf.mxu1 }
 0x217   : > { %v382_v60 = vsel %vm192_vm1, %v379_v58, 0.0  ;;  %v389_v61 = vmul.f32 %v379_v58, %v379_v58 }
 0x218   : > { %v383_v62 = vrot.slane %v382_v60, 4 }
 0x219   : > { %v390_v63 = vsel %vm192_vm1, %v389_v61, 0.0 }
 0x21a   : > { %v384_v1 = vadd.f32 %v383_v62, %v382_v60  ;;  %v391_v2 = vrot.slane %v390_v63, 4 }
 0x21c   : > { %v385_v3 = vrot.slane %v384_v1, 2  ;;  %v392_v4 = vadd.f32 %v391_v2, %v390_v63 }
 0x21e   : > { %v386_v5 = vadd.f32 %v385_v3, %v384_v1  ;;  %v393_v0 = vrot.slane %v392_v4, 2 }
 0x220   : > { %v387_v6 = vrot.slane %v386_v5, 1  ;;  %v394_v7 = vadd.f32 %v393_v0, %v392_v4 }
 0x222   : > { %v388_v8 = vadd.f32 %v387_v6, %v386_v5  ;;  %v395_v9 = vrot.slane %v394_v7, 1 }
 0x224   : > { %v396_v10 = vadd.f32 %v395_v9, %v394_v7  ;;  %v397_v12 = vmul.f32 0.125, %v388_v8 }
 0x226   : > { %v398_v14 = vmul.f32 0.125, %v396_v10  ;;  %v399_v15 = vmul.f32 %v397_v12, %v397_v12 }
 0x228   : > { %v400_v16 = vsub.f32 %v398_v14, %v399_v15 }
 0x22a   : > { %v401_v17 = vmax.f32 %v400_v16, 0.0 }
 0x22c   : > { %v402_v18 = vadd.f32 1e-05, %v401_v17 }
 0x22e   : > { %723 = vrsqrt.f32 %v402_v18 }
 0x23b   : > { %v724_v19 = vpop.eup %723 }
 0x23c   : > { %v404_v20 = vmul.f32 %v724_v19, %v1012_v13 }
 0x23e   : > { %v405_v22 = vmul.f32 %v404_v20, %v397_v12  ;;  %v413_v24 = vrot.slane %v404_v20, %v412_v21 }
 0x240   : > { %v407_v23 = vrot.slane %v405_v22, 7  ;;  %v414_v27 = vmul.f32 %v413_v24, %v379_v58 }
 0x242   : > { %v409_v26 = vsub.f32 %v1012_v13, %v407_v23 }
 0x244   : > { %v418_v28 = vrot.slane %v409_v26, %v417_v25 }
 0x246   : > { %v419_v29 = vadd.f32 %v418_v28, %v414_v27 }
 0x248   : > { %725 = vtanh.f32 %v419_v29 }
 0x255   : > { %v726_v30 = vpop.eup %725 }
 0x256   : > { %656 = vmatmul.mubr.msk.f32.vlgmr.msra.gmra.mxu0 %vm192_vm1, %v726_v30 }
 0x316   : > { %v494_v33 = vpop.f32.mrf.mxu0 }
 0x317   : > { %v495_v34 = vadd.f32 %v494_v33, %v424_v32 }
 0x318   : > { %v657_v35 = vpop.f32.mrf.mxu0 }
 0x319   : > { %498 = vst [vmem:[%s173_s17] sm:$0xff] %v495_v34 }
 0x31a   : > { %794 = shalt.err (!%p791_p0)
}
 0x31b   : > { %s795_s27 = scalar_lea.hbm %s1042_s20, 128  ;;  %s799_s4 = scalar_lea.hbm %s1080_s2, 512 }
 0x31c   : > { %p796_p5 = scmp.ne.s32.totalorder %s1042_s20, %s795_s27  ;;  %p800_p1 = scmp.lt.s32.totalorder %s1042_s20, %s1080_s2 }
 0x31d   : > { %p801_p4 = scmp.lt.s32.totalorder %s799_s4, %s795_s27 }
 0x31e   : > { %p797_p9 = pnand %p796_p5, %p1096_p3 }
 0x31f   : > { %p802_p6 = por %p801_p4, %p800_p1 }
 0x320   : > { %p798_p11 = pneg %p797_p9 }
 0x322   : > { %p803_p8 = pnand %p802_p6, %p798_p11 }
 0x324   : > { %806 = shalt.err (!%p803_p8)
}
 0x325   : > { %664 = dma.vmem_to_hbm [thread:$0]  (%p1096_p3), %s514_s8, 128, %s1042_s20, %s500_s23  }
 0x326 PF: > { %p681_p10 = scmp.ge.s32.totalorder %s849_s12, 2  ;;  %s525_s7 = sand.u32 1, %s837_s9  }
 0x327   : > { %p1097_p7 = scmp.ne.s32.totalorder %s1086_s16, 0  ;;  %s526_s14 = scalar_lea.sflag [#allocation4], %s525_s7 }
 0x329   : > { %p675_p12 = pnand %p681_p10, %p1097_p7 }
 0x32b   : > { %p676_p2 = pneg %p675_p12 }
 0x32d   : > { %832 = dma.done.wait (%p676_p2), %s526_s14, 128  }
 0x32e   : > { %834 = vsyncadd (%p676_p2), %s526_s14, 4294967168  ;;  %p16_p13 = scmp.ge.s32.totalorder %s926_s21, 6   ;;  %s1098_s9 = smov %s841_s10 }
 0x32f   : > { %s1099_s10 = smov %s845_s11  ;;  %s1100_s11 = smov %s943_s29 }
 0x330   : > { %s1101_s12 = smov %s926_s21  ;;  %18 = sbr.rel (!%p16_p13) target bundleno = 6 (0x6), region = 77 }
 0x335   :  { %531 = vsyncpa [#allocation3], 1 }
 0x336   :  { %533 = vsyncpa [#allocation3 + $0x1], 1 }
 0x337   :  { %534 = vsyncpa [#allocation6], 1 }
 0x338   :  { %535 = vsyncpa [#allocation4], 1 }
 0x339   :  { %537 = vsyncpa [#allocation4 + $0x1], 1 }

</bundles_post_ra>
